<compile_context>
chip_gen: v5e
topology: v5e:2x2
jax: 0.10.0
libtpu: 0.0.40
codegen_flags: <defaults>
</compile_context>

<pallas_src>
import jax
import jax.numpy as jnp
from jax import lax
from jax.experimental import pallas as pl
from jax.experimental.pallas import tpu as pltpu


_VMEM_BUDGET = 48 * 1024 * 1024  # conservative: leaves headroom on v7x (64 MiB physical)


def _round_up(x, m):
    return ((x + m - 1) // m) * m


def _softplus_torch(x, beta=0.5, threshold=14.0):
    # PyTorch Softplus: (1/beta)*log(1+exp(beta*x)) when beta*x <= threshold else x
    bx = beta * x
    safe = jnp.minimum(bx, threshold)  # avoid overflow in the dead branch
    return jnp.where(bx <= threshold, (1.0 / beta) * jnp.log1p(jnp.exp(safe)), x)


# --------------------------------------------------------------------------
# Pass A: per-edge filter MLP + source-feature gather + multiply.
# Grid: (edge tiles,)  -- every edge is touched exactly once.
# --------------------------------------------------------------------------
def edge_message_kernel(rbf_ref, w1_ref, b1_ref, w2_ref, b2_ref,
                        src_oh_ref, node_ref, msg_ref):
    # Filter MLP: bf16 operands straight to the MXU, f32 accumulation.
    h1 = jnp.dot(rbf_ref[...], w1_ref[...],
                 preferred_element_type=jnp.float32) + b1_ref[...]        # [Et, D] f32
    a = _softplus_torch(h1).astype(jnp.bfloat16)                           # EUP, f32 math
    h = jnp.dot(a, w2_ref[...],
                preferred_element_type=jnp.float32) + b2_ref[...]          # [Et, D] f32

    # Gather source-node features per edge: bf16 one-hot @ bf16 features
    # (0/1 weights are exact in bf16) with f32 accumulation.
    src_feat = jnp.dot(src_oh_ref[...], node_ref[...],
                       preferred_element_type=jnp.float32)                 # [Et, D] f32

    msg_ref[...] = (src_feat * h).astype(msg_ref.dtype)                    # bf16 -> HBM


# --------------------------------------------------------------------------
# Pass B: scatter-add messages into their destination nodes.
# Grid: (node tiles [parallel], edge tiles [arbitrary / reduction]).
# Output block index (n, 0) is invariant across the edge axis, so the block
# stays VMEM-resident and we accumulate into it directly (no scratch).
# --------------------------------------------------------------------------
def scatter_add_kernel(dst_oh_ref, msg_ref, out_ref):
    e = pl.program_id(1)

    @pl.when(e == 0)
    def _():
        out_ref[...] = jnp.zeros_like(out_ref)

    # dst_oh^T @ msg without materializing any transpose: contract edge axis.
    out_ref[...] += lax.dot_general(
        dst_oh_ref[...], msg_ref[...],
        dimension_numbers=(((0,), (0,)), ((), ())),
        preferred_element_type=jnp.float32)                                # [Nt, D] f32


def cfconv_forward(rbf, w1, b1, w2, b2, src_idx, dst_idx, node_feat,
                   *, edge_tile=512, node_tile=128):
    """rbf: [E, rbf_dim] f32; node_feat: [N, dim] f32; src/dst_idx: [E] i32."""
    E, R = rbf.shape
    N, D = node_feat.shape
    f32, bf16 = jnp.float32, jnp.bfloat16

    # Lane-dense padding: feature axes -> multiples of 128.
    R_pad = _round_up(R, 128)
    D_pad = _round_up(D, 128)
    N_pad = _round_up(N, node_tile)  # node_tile is a multiple of 128

    # Don't over-pad tiny edge sets, then shrink edge_tile until the pass-A
    # working set (double-buffered streamed bf16 tiles + resident weights and
    # node features) fits the per-generation VMEM budget (v7x: 64 MiB).
    edge_tile = max(128, min(edge_tile, _round_up(E, 128)))
    resident = 2 * (R_pad * D_pad + D_pad * D_pad + N_pad * D_pad) + 8 * D_pad
    while edge_tile > 128:
        streamed = 2 * 2 * edge_tile * (R_pad + N_pad + D_pad)  # bf16, double-buffered
        if streamed + resident <= _VMEM_BUDGET:
            break
        edge_tile //= 2
    E_pad = _round_up(E, edge_tile)

    # bf16 MXU-feed operands (biases / output stay f32).
    rbf_p = jnp.zeros((E_pad, R_pad), bf16).at[:E, :R].set(rbf.astype(bf16))
    w1_p = jnp.zeros((R_pad, D_pad), bf16).at[:R, :D].set(w1.astype(bf16))
    b1_p = jnp.zeros((1, D_pad), f32).at[:, :D].set(b1.reshape(1, D))
    w2_p = jnp.zeros((D_pad, D_pad), bf16).at[:D, :D].set(w2.astype(bf16))
    b2_p = jnp.zeros((1, D_pad), f32).at[:, :D].set(b2.reshape(1, D))
    node_p = jnp.zeros((N_pad, D_pad), bf16).at[:N, :D].set(node_feat.astype(bf16))

    # Incidence matrices in bf16 (0/1 is exact). Padded edges -> index -1 ->
    # all-zero one-hot rows -> no contribution to gather or scatter.
    pad_idx = jnp.full((E_pad - E,), -1, jnp.int32)
    src_full = jnp.concatenate([src_idx.astype(jnp.int32), pad_idx])
    dst_full = jnp.concatenate([dst_idx.astype(jnp.int32), pad_idx])
    src_oh = jax.nn.one_hot(src_full, N_pad, dtype=bf16)   # [E_pad, N_pad]
    dst_oh = jax.nn.one_hot(dst_full, N_pad, dtype=bf16)   # [E_pad, N_pad]

    # ---------------------- Pass A: edge messages ----------------------
    msg = pl.pallas_call(
        edge_message_kernel,
        out_shape=jax.ShapeDtypeStruct((E_pad, D_pad), bf16),
        grid_spec=pltpu.PrefetchScalarGridSpec(
            num_scalar_prefetch=0,
            grid=(E_pad // edge_tile,),
            in_specs=[
                pl.BlockSpec((edge_tile, R_pad), lambda e: (e, 0)),     # rbf (streamed)
                pl.BlockSpec((R_pad, D_pad), lambda e: (0, 0)),         # w1 (resident)
                pl.BlockSpec((1, D_pad), lambda e: (0, 0)),             # b1
                pl.BlockSpec((D_pad, D_pad), lambda e: (0, 0)),         # w2
                pl.BlockSpec((1, D_pad), lambda e: (0, 0)),             # b2
                pl.BlockSpec((edge_tile, N_pad), lambda e: (e, 0)),     # src one-hot (streamed)
                pl.BlockSpec((N_pad, D_pad), lambda e: (0, 0)),         # node features (resident)
            ],
            out_specs=pl.BlockSpec((edge_tile, D_pad), lambda e: (e, 0)),
        ),
        compiler_params=pltpu.CompilerParams(
            dimension_semantics=("parallel",),
            vmem_limit_bytes=_VMEM_BUDGET),
    )(rbf_p, w1_p, b1_p, w2_p, b2_p, src_oh, node_p)

    # ---------------------- Pass B: scatter-add ----------------------
    out = pl.pallas_call(
        scatter_add_kernel,
        out_shape=jax.ShapeDtypeStruct((N_pad, D_pad), f32),
        grid_spec=pltpu.PrefetchScalarGridSpec(
            num_scalar_prefetch=0,
            grid=(N_pad // node_tile, E_pad // edge_tile),
            in_specs=[
                pl.BlockSpec((edge_tile, node_tile), lambda n, e: (e, n)),  # dst one-hot
                pl.BlockSpec((edge_tile, D_pad), lambda n, e: (e, 0)),      # messages
            ],
            out_specs=pl.BlockSpec((node_tile, D_pad), lambda n, e: (n, 0)),
        ),
        compiler_params=pltpu.CompilerParams(
            dimension_semantics=("parallel", "arbitrary"),
            vmem_limit_bytes=_VMEM_BUDGET),
    )(dst_oh, msg)

    return out[:N, :D]


# --------------------------------------------------------------------------
# References
# --------------------------------------------------------------------------
def _reference_f32(rbf, w1, b1, w2, b2, src_idx, dst_idx, node_feat):
    h = _softplus_torch(rbf @ w1 + b1) @ w2 + b2
    msg = node_feat[src_idx] * h
    out = jnp.zeros_like(node_feat)
    return out.at[dst_idx].add(msg)


def _reference_bf16(rbf, w1, b1, w2, b2, src_idx, dst_idx, node_feat):
    # Emulates the kernel numerics: bf16 MXU inputs, f32 accumulation.
    bf, f32 = jnp.bfloat16, jnp.float32
    r = lambda x: x.astype(bf).astype(f32)
    h1 = r(rbf) @ r(w1) + b1
    a = r(_softplus_torch(h1))
    h = a @ r(w2) + b2
    msg = (r(node_feat)[src_idx] * h).astype(bf).astype(f32)
    out = jnp.zeros_like(node_feat)
    return out.at[dst_idx].add(msg)


if __name__ == "__main__":
    key = jax.random.PRNGKey(0)
    k1, k2, k3, k4, k5, k6, k7, k8 = jax.random.split(key, 8)

    # Small shapes consistent with the module: rbf_dim=32, dim=64
    rbf_dim, dim = 32, 64
    N, E = 8, 16  # nodes, edges

    # Deterministic parameter init (PyTorch-Linear-style uniform ranges).
    lim1 = 1.0 / jnp.sqrt(rbf_dim)
    lim2 = 1.0 / jnp.sqrt(dim)
    # Weights stored already transposed for right-multiplication: y = x @ W + b
    w1 = jax.random.uniform(k1, (rbf_dim, dim), jnp.float32, -lim1, lim1)
    b1 = jax.random.uniform(k2, (1, dim), jnp.float32, -lim1, lim1)
    w2 = jax.random.uniform(k3, (dim, dim), jnp.float32, -lim2, lim2)
    b2 = jax.random.uniform(k4, (1, dim), jnp.float32, -lim2, lim2)

    # Graph data
    rbf = jax.random.normal(k5, (E, rbf_dim), jnp.float32)
    node_feat = jax.random.normal(k6, (N, dim), jnp.float32)   # g.ndata['new_node']
    src_idx = jax.random.randint(k7, (E,), 0, N, jnp.int32)
    dst_idx = jax.random.randint(k8, (E,), 0, N, jnp.int32)

    out = cfconv_forward(rbf, w1, b1, w2, b2, src_idx, dst_idx, node_feat)
    out = jax.block_until_ready(out)
    assert out.shape == (N, dim)

    # Tight check against a reference that emulates the kernel's bf16 feeds.
    ref_bf16 = _reference_bf16(rbf, w1, b1, w2, b2, src_idx, dst_idx, node_feat)
    assert jnp.allclose(out, ref_bf16, atol=2e-3, rtol=2e-3), "mismatch vs bf16-emulated reference"

    # Sanity check against the pure-f32 module semantics (bf16 input rounding tolerance).
    ref_f32 = _reference_f32(rbf, w1, b1, w2, b2, src_idx, dst_idx, node_feat)
    assert jnp.allclose(out, ref_f32, atol=5e-2, rtol=5e-2), "mismatch vs f32 reference"

    print("KERNEL_OK")
</pallas_src>

<mosaic_0001>
module attributes {stable_mosaic.version = 11 : i64} {
  func.func @edge_message_kernel(%arg0: i32, %arg1: memref<128x128xbf16, #tpu.memory_space<vmem>>, %arg2: memref<128x128xbf16, #tpu.memory_space<vmem>>, %arg3: memref<1x128xf32, #tpu.memory_space<vmem>>, %arg4: memref<128x128xbf16, #tpu.memory_space<vmem>>, %arg5: memref<1x128xf32, #tpu.memory_space<vmem>>, %arg6: memref<128x128xbf16, #tpu.memory_space<vmem>>, %arg7: memref<128x128xbf16, #tpu.memory_space<vmem>>, %arg8: memref<128x128xbf16, #tpu.memory_space<vmem>>) attributes {dimension_semantics = [#tpu.dimension_semantics<parallel>], iteration_bounds = array<i64: 1>, scalar_prefetch = 0 : i64, scratch_operands = 0 : i64, tpu.core_type = #tpu.core_type<tc>, window_params = [{transform_indices = @transform_0, window_bounds = array<i64: 128, 128>}, {pipeline_mode = #tpu.pipeline_mode<synchronous>, transform_indices = @transform_1, window_bounds = array<i64: 128, 128>}, {pipeline_mode = #tpu.pipeline_mode<synchronous>, transform_indices = @transform_2, window_bounds = array<i64: 1, 128>}, {pipeline_mode = #tpu.pipeline_mode<synchronous>, transform_indices = @transform_3, window_bounds = array<i64: 128, 128>}, {pipeline_mode = #tpu.pipeline_mode<synchronous>, transform_indices = @transform_4, window_bounds = array<i64: 1, 128>}, {transform_indices = @transform_5, window_bounds = array<i64: 128, 128>}, {pipeline_mode = #tpu.pipeline_mode<synchronous>, transform_indices = @transform_6, window_bounds = array<i64: 128, 128>}, {transform_indices = @transform_7, window_bounds = array<i64: 128, 128>}]} {
    %c0 = arith.constant 0 : index
    %c0_0 = arith.constant 0 : index
    %0 = vector.load %arg1[%c0, %c0_0] : memref<128x128xbf16, #tpu.memory_space<vmem>>, vector<128x128xbf16>
    %c0_1 = arith.constant 0 : index
    %c0_2 = arith.constant 0 : index
    %1 = vector.load %arg2[%c0_1, %c0_2] : memref<128x128xbf16, #tpu.memory_space<vmem>>, vector<128x128xbf16>
    %cst = arith.constant dense<0.000000e+00> : vector<128x128xf32>
    %2 = tpu.matmul %0, %1, %cst {dimension_numbers = #tpu.dot_dimension_numbers<[1], [0], [0], [1], [0, 0, 1, 1], [], []>} : vector<128x128xbf16>, vector<128x128xbf16>, vector<128x128xf32> -> vector<128x128xf32>
    %c0_3 = arith.constant 0 : index
    %c0_4 = arith.constant 0 : index
    %3 = vector.load %arg3[%c0_3, %c0_4] : memref<1x128xf32, #tpu.memory_space<vmem>>, vector<1x128xf32>
    %4 = vector.broadcast %3 : vector<1x128xf32> to vector<128x128xf32>
    %5 = arith.addf %2, %4 : vector<128x128xf32>
    %cst_5 = arith.constant 5.000000e-01 : f32
    %6 = vector.broadcast %cst_5 : f32 to vector<128x128xf32>
    %7 = arith.mulf %6, %5 : vector<128x128xf32>
    %cst_6 = arith.constant 1.400000e+01 : f32
    %8 = vector.broadcast %cst_6 : f32 to vector<128x128xf32>
    %9 = arith.minimumf %7, %8 : vector<128x128xf32>
    %cst_7 = arith.constant 1.400000e+01 : f32
    %10 = vector.broadcast %cst_7 : f32 to vector<128x128xf32>
    %11 = arith.cmpf ole, %7, %10 : vector<128x128xf32>
    %12 = math.exp %9 : vector<128x128xf32>
    %13 = math.log1p %12 : vector<128x128xf32>
    %cst_8 = arith.constant 2.000000e+00 : f32
    %14 = vector.broadcast %cst_8 : f32 to vector<128x128xf32>
    %15 = arith.mulf %14, %13 : vector<128x128xf32>
    %16 = arith.select %11, %15, %5 : vector<128x128xi1>, vector<128x128xf32>
    %17 = arith.truncf %16 : vector<128x128xf32> to vector<128x128xbf16>
    %c0_9 = arith.constant 0 : index
    %c0_10 = arith.constant 0 : index
    %18 = vector.load %arg4[%c0_9, %c0_10] : memref<128x128xbf16, #tpu.memory_space<vmem>>, vector<128x128xbf16>
    %cst_11 = arith.constant dense<0.000000e+00> : vector<128x128xf32>
    %19 = tpu.matmul %17, %18, %cst_11 {dimension_numbers = #tpu.dot_dimension_numbers<[1], [0], [0], [1], [0, 0, 1, 1], [], []>} : vector<128x128xbf16>, vector<128x128xbf16>, vector<128x128xf32> -> vector<128x128xf32>
    %c0_12 = arith.constant 0 : index
    %c0_13 = arith.constant 0 : index
    %20 = vector.load %arg5[%c0_12, %c0_13] : memref<1x128xf32, #tpu.memory_space<vmem>>, vector<1x128xf32>
    %21 = vector.broadcast %20 : vector<1x128xf32> to vector<128x128xf32>
    %22 = arith.addf %19, %21 : vector<128x128xf32>
    %c0_14 = arith.constant 0 : index
    %c0_15 = arith.constant 0 : index
    %23 = vector.load %arg6[%c0_14, %c0_15] : memref<128x128xbf16, #tpu.memory_space<vmem>>, vector<128x128xbf16>
    %c0_16 = arith.constant 0 : index
    %c0_17 = arith.constant 0 : index
    %24 = vector.load %arg7[%c0_16, %c0_17] : memref<128x128xbf16, #tpu.memory_space<vmem>>, vector<128x128xbf16>
    %cst_18 = arith.constant dense<0.000000e+00> : vector<128x128xf32>
    %25 = tpu.matmul %23, %24, %cst_18 {dimension_numbers = #tpu.dot_dimension_numbers<[1], [0], [0], [1], [0, 0, 1, 1], [], []>} : vector<128x128xbf16>, vector<128x128xbf16>, vector<128x128xf32> -> vector<128x128xf32>
    %26 = arith.mulf %25, %22 : vector<128x128xf32>
    %27 = arith.truncf %26 : vector<128x128xf32> to vector<128x128xbf16>
    %c0_19 = arith.constant 0 : index
    %c0_20 = arith.constant 0 : index
    %28 = vector.load %arg8[%c0_19, %c0_20] : memref<128x128xbf16, #tpu.memory_space<vmem>>, vector<128x128xbf16>
    tpu.vector_store %arg8[%c0_19, %c0_20], %27 {strides = array<i32>} : memref<128x128xbf16, #tpu.memory_space<vmem>>, vector<128x128xbf16>,
    return
  }
  func.func @transform_0(%arg0: i32) -> (i32, i32) {
    %c0_i32 = arith.constant 0 : i32
    %c0_i32_0 = arith.constant 0 : i32
    return %arg0, %c0_i32 : i32, i32
  }
  func.func @transform_1(%arg0: i32) -> (i32, i32) {
    %c0_i32 = arith.constant 0 : i32
    %c0_i32_0 = arith.constant 0 : i32
    %c0_i32_1 = arith.constant 0 : i32
    return %c0_i32, %c0_i32_0 : i32, i32
  }
  func.func @transform_2(%arg0: i32) -> (i32, i32) {
    %c0_i32 = arith.constant 0 : i32
    %c0_i32_0 = arith.constant 0 : i32
    %c0_i32_1 = arith.constant 0 : i32
    return %c0_i32, %c0_i32_0 : i32, i32
  }
  func.func @transform_3(%arg0: i32) -> (i32, i32) {
    %c0_i32 = arith.constant 0 : i32
    %c0_i32_0 = arith.constant 0 : i32
    %c0_i32_1 = arith.constant 0 : i32
    return %c0_i32, %c0_i32_0 : i32, i32
  }
  func.func @transform_4(%arg0: i32) -> (i32, i32) {
    %c0_i32 = arith.constant 0 : i32
    %c0_i32_0 = arith.constant 0 : i32
    %c0_i32_1 = arith.constant 0 : i32
    return %c0_i32, %c0_i32_0 : i32, i32
  }
  func.func @transform_5(%arg0: i32) -> (i32, i32) {
    %c0_i32 = arith.constant 0 : i32
    %c0_i32_0 = arith.constant 0 : i32
    return %arg0, %c0_i32 : i32, i32
  }
  func.func @transform_6(%arg0: i32) -> (i32, i32) {
    %c0_i32 = arith.constant 0 : i32
    %c0_i32_0 = arith.constant 0 : i32
    %c0_i32_1 = arith.constant 0 : i32
    return %c0_i32, %c0_i32_0 : i32, i32
  }
  func.func @transform_7(%arg0: i32) -> (i32, i32) {
    %c0_i32 = arith.constant 0 : i32
    %c0_i32_0 = arith.constant 0 : i32
    return %arg0, %c0_i32 : i32, i32
  }
}

</mosaic_0001>

<bundles_post_ra>
// kernel: tpu_custom_call.1
= control target key start
LH: loop header
LB: loop body
LE: loop exit
PB: predicated region body
PF: predicated region fallthrough
CT: control target
= control target key end

     0   :  { %12 = vsyncpa [#allocation3], 0  ;;  %s1740_s0 = inlined_call_operand.hbm [shape: bf16[128,128], index: 0, kind: input, shape index: {}]   ;;  %s1741_s1 = inlined_call_operand.hbm [shape: bf16[128,128], index: 1, kind: input, shape index: {}]   ;;  %s1742_s2 = inlined_call_operand.vmem [shape: f32[1,128], index: 2, kind: input, shape index: {}]   ;;  %s1743_s3 = inlined_call_operand.hbm [shape: bf16[128,128], index: 3, kind: input, shape index: {}]   ;;  %s1744_s4 = inlined_call_operand.vmem [shape: f32[1,128], index: 4, kind: input, shape index: {}]   ;;  %s1745_s5 = inlined_call_operand.hbm [shape: bf16[128,128], index: 5, kind: input, shape index: {}]   ;;  %s1746_s6 = inlined_call_operand.hbm [shape: bf16[128,128], index: 6, kind: input, shape index: {}]   ;;  %s1747_s7 = inlined_call_operand.hbm [shape: bf16[128,128], index: 7, kind: output, shape index: {}]  }
   0x1   :  { %13 = vsyncpa [#allocation6], 0 }
   0x2   :  { %14 = vsyncpa [#allocation9], 0 }
   0x3   :  { %15 = vsyncpa [#allocation4], 0  ;;  %s33_s26 = sshll.u32 %s1741_s1, 4  ;;  %s1410_s27 = smov [#allocation5]   ;;  %s34_s26 = int_to_ptr.hbm [resolvable:$true] %s33_s26 }
   0x4   :  { %s35_s28 = sshll.u32 %s1410_s27, 4  ;;  %s63_s8 = sshll.u32 %s1745_s5, 4  ;;  %s36_s28 = int_to_ptr.vmem [resolvable:$true] %s35_s28  ;;  %s64_s8 = int_to_ptr.hbm [resolvable:$true] %s63_s8 }
   0x5   :  { %s1411_s9 = smov 64   ;;  %s1412_s10 = smov 4  }
   0x6   :  { %41 = dma.hbm_to_vmem [thread:$0]  %s34_s26, 1024, %s36_s28, [#allocation6], %s1411_s9, %s1411_s9, %s1412_s10  }
   0x7   :  { %s1413_s11 = smov [#allocation8]   ;;  %s20_s1 = sshll.u32 %s1740_s0, 4  ;;  %s21_s1 = int_to_ptr.hbm [resolvable:$true] %s20_s1 }
   0x8   :  { %s65_s12 = sshll.u32 %s1413_s11, 4  ;;  %s48_s16 = sshll.u32 %s1743_s3, 4  ;;  %s66_s12 = int_to_ptr.vmem [resolvable:$true] %s65_s12  ;;  %s49_s16 = int_to_ptr.hbm [resolvable:$true] %s48_s16 }
   0x9   :  { %71 = dma.hbm_to_vmem [thread:$0]  %s64_s8, 1024, %s66_s12, [#allocation9], %s1411_s9, %s1411_s9, %s1412_s10  }
   0xa   :  { %s1414_s17 = smov [#allocation2]   ;;  %s1415_s19 = smov [#allocation7]  }
   0xb   :  { %s22_s18 = sshll.u32 %s1414_s17, 4  ;;  %s50_s0 = sshll.u32 %s1415_s19, 4  ;;  %s23_s18 = int_to_ptr.vmem [resolvable:$true] %s22_s18  ;;  %s51_s0 = int_to_ptr.vmem [resolvable:$true] %s50_s0 }
   0xc   :  { %28 = dma.hbm_to_vmem [thread:$0]  %s21_s1, 1024, %s23_s18, [#allocation3], %s1411_s9, %s1411_s9, %s1412_s10  }
   0xd   :  { %s76_s22 = sshll.u32 %s1746_s6, 4  ;;  %s1416_s3 = smov [#allocation10]   ;;  %s77_s22 = int_to_ptr.hbm [resolvable:$true] %s76_s22 }
   0xe   :  { %56 = dma.hbm_to_vmem [thread:$0]  %s49_s16, 1024, %s51_s0, [#allocation6], %s1411_s9, %s1411_s9, %s1412_s10  }
   0xf   :  { %s78_s23 = sshll.u32 %s1416_s3, 4  ;;  %s79_s23 = int_to_ptr.vmem [resolvable:$true] %s78_s23 }
  0x10   :  { %84 = dma.hbm_to_vmem [thread:$0]  %s77_s22, 1024, %s79_s23, [#allocation9], %s1411_s9, %s1411_s9, %s1412_s10  }
  0x11   :  { %1402 = dma.done.wait [#allocation3], 1024  }
  0x12   :  { %1403 = vsyncadd [#allocation3], 4294966272 }
  0x13   :  { %1404 = dma.done.wait [#allocation6], 2048  }
  0x14   :  { %1405 = vsyncadd [#allocation6], 4294965248 }
  0x15   :  { %1406 = dma.done.wait [#allocation9], 2048  }
  0x16   :  { %1407 = vsyncadd [#allocation9], 4294965248  ;;  %v1088_v0 = vld [vmem:[#allocation5 + $0x38] sm:$0xff]  ;;  %v1087_v1 = vld [vmem:[#allocation5 + $0x30] sm:$0xff]  ;;  %s898_s29 = sshll.u32 %s1747_s7, 4  ;;  %s899_s29 = int_to_ptr.hbm [resolvable:$true] %s898_s29 }
  0x17   :  { %237 = vmatpush.bf16.msra.mxu0 %v1088_v0  ;;  %1160 = vmatpush.bf16.msra.mxu3 %v1088_v0  ;;  %v1086_v2 = vld [vmem:[#allocation5 + $0x28] sm:$0xff]  ;;  %v1085_v3 = vld [vmem:[#allocation5 + $0x20] sm:$0xff]  ;;  %v1084_v4 = vld [vmem:[#allocation5 + $0x18] sm:$0xff] }
  0x18   :  { %v1083_v5 = vld [vmem:[#allocation5 + $0x10] sm:$0xff]  ;;  %v1082_v6 = vld [vmem:[#allocation5 + $0x8] sm:$0xff]  ;;  %v1081_v7 = vld [vmem:[#allocation5] sm:$0xff] }
  0x19   :  { %v1073_v8 = vld [vmem:[#allocation2] sm:$0xff]  ;;  %v1079_v9 = vld [vmem:[#allocation2 + $0x30] sm:$0xff]  ;;  %v1074_v10 = vld [vmem:[#allocation2 + $0x8] sm:$0xff] }
  0x1a   :  { %v1080_v11 = vld [vmem:[#allocation2 + $0x38] sm:$0xff]  ;;  %v1075_v12 = vld [vmem:[#allocation2 + $0x10] sm:$0xff]  ;;  %v1077_v15 = vld [vmem:[#allocation2 + $0x20] sm:$0xff] }
  0x1b   :  { %238 = vmatpush.bf16.msra.mxu0 %v1087_v1  ;;  %1161 = vmatpush.bf16.msra.mxu3 %v1087_v1  ;;  %v1076_v13 = vld [vmem:[#allocation2 + $0x18] sm:$0xff]  ;;  %v1078_v16 = vld [vmem:[#allocation2 + $0x28] sm:$0xff]  ;;  %v1111_v17 = vld [vmem:[#allocation10 + $0x30] sm:$0xff] }
  0x1c   :  { %v1112_v14 = vld [vmem:[#allocation10 + $0x38] sm:$0xff]  ;;  %v1488_v18 = vld [vmem:[#allocation10 + $0x28] sm:$0xff]  ;;  %v1491_v20 = vld [vmem:[#allocation10 + $0x20] sm:$0xff] }
  0x1d   :  { %795 = vmatpush.bf16.msra.mxu2 %v1112_v14  ;;  %v1096_v19 = vld [vmem:[#allocation7 + $0x38] sm:$0xff]  ;;  %v1095_v21 = vld [vmem:[#allocation7 + $0x30] sm:$0xff]  ;;  %v1094_v23 = vld [vmem:[#allocation7 + $0x28] sm:$0xff] }
  0x1e   :  { %618 = vmatpush.bf16.msra.mxu1 %v1096_v19  ;;  %v1494_v22 = vld [vmem:[#allocation10 + $0x18] sm:$0xff]  ;;  %v1497_v24 = vld [vmem:[#allocation10 + $0x10] sm:$0xff]  ;;  %v1093_v25 = vld [vmem:[#allocation7 + $0x20] sm:$0xff] }
  0x1f   :  { %239 = vmatpush.bf16.msra.mxu0 %v1086_v2  ;;  %1162 = vmatpush.bf16.msra.mxu3 %v1086_v2  ;;  %v1500_v26 = vld [vmem:[#allocation10 + $0x8] sm:$0xff]  ;;  %v1092_v27 = vld [vmem:[#allocation7 + $0x18] sm:$0xff]  ;;  %v1503_v28 = vld [vmem:[#allocation10] sm:$0xff] }
  0x20   :  { %v1097_v29 = vld [vmem:[#allocation8] sm:$0xff]  ;;  %v1091_v30 = vld [vmem:[#allocation7 + $0x10] sm:$0xff]  ;;  %v1090_v33 = vld [vmem:[#allocation7 + $0x8] sm:$0xff] }
  0x21   :  { %796 = vmatpush.bf16.msra.mxu2 %v1111_v17  ;;  %v1509_v31 = vld [vmem:[%s1742_s2] ss:$0 sm:$0xff]  ;;  %v1098_v46 = vld [vmem:[#allocation8 + $0x8] sm:$0xff] }
  0x22   :  { %619 = vmatpush.bf16.msra.mxu1 %v1095_v21  ;;  %v1089_v36 = vld [vmem:[#allocation7] sm:$0xff] }
  0x23   :  { %240 = vmatpush.bf16.msra.mxu0 %v1085_v3  ;;  %1163 = vmatpush.bf16.msra.mxu3 %v1085_v3 }
  0x25   :  { %797 = vmatpush.bf16.msra.mxu2 %v1488_v18 }
  0x26   :  { %620 = vmatpush.bf16.msra.mxu1 %v1094_v23 }
  0x27   :  { %241 = vmatpush.bf16.msra.mxu0 %v1084_v4  ;;  %1164 = vmatpush.bf16.msra.mxu3 %v1084_v4 }
  0x29   :  { %798 = vmatpush.bf16.msra.mxu2 %v1491_v20 }
  0x2a   :  { %621 = vmatpush.bf16.msra.mxu1 %v1093_v25 }
  0x2b   :  { %242 = vmatpush.bf16.msra.mxu0 %v1083_v5  ;;  %1165 = vmatpush.bf16.msra.mxu3 %v1083_v5 }
  0x2d   :  { %799 = vmatpush.bf16.msra.mxu2 %v1494_v22 }
  0x2e   :  { %622 = vmatpush.bf16.msra.mxu1 %v1092_v27 }
  0x2f   :  { %243 = vmatpush.bf16.msra.mxu0 %v1082_v6  ;;  %1166 = vmatpush.bf16.msra.mxu3 %v1082_v6 }
  0x31   :  { %800 = vmatpush.bf16.msra.mxu2 %v1497_v24 }
  0x32   :  { %623 = vmatpush.bf16.msra.mxu1 %v1091_v30 }
  0x33   :  { %244 = vmatpush.bf16.msra.mxu0 %v1081_v7  ;;  %1167 = vmatpush.bf16.msra.mxu3 %v1081_v7 }
  0x35   :  { %801 = vmatpush.bf16.msra.mxu2 %v1500_v26 }
  0x36   :  { %245 = vmatmul.bf16.vlgmr.msra.gmra.mxu0 %v1073_v8  ;;  %275 = vmatmul.bf16.vlgmr.msra.gmra.mxu3 %v1079_v9 }
  0x37   :  { %1168 = vmatpush.bf16.msrb.mxu3 %v1096_v19  ;;  %624 = vmatpush.bf16.msra.mxu1 %v1090_v33 }
  0x39   :  { %802 = vmatpush.bf16.msra.mxu2 %v1503_v28 }
  0x3b   :  { %1169 = vmatpush.bf16.msrb.mxu3 %v1095_v21  ;;  %625 = vmatpush.bf16.msra.mxu1 %v1089_v36 }
  0x3c   :  { %803 = vmatmul.bf16.vlgmr.msra.gmra.mxu2 %v1097_v29 }
  0x3f   :  { %1170 = vmatpush.bf16.msrb.mxu3 %v1094_v23 }
  0x43   :  { %1171 = vmatpush.bf16.msrb.mxu3 %v1093_v25 }
  0x46   :  { %250 = vmatmul.bf16.gmra.mxu0 %v1074_v10  ;;  %280 = vmatmul.bf16.gmra.mxu3 %v1080_v11 }
  0x47   :  { %1172 = vmatpush.bf16.msrb.mxu3 %v1092_v27 }
  0x4b   :  { %1173 = vmatpush.bf16.msrb.mxu3 %v1091_v30 }
  0x4c   :  { %808 = vmatmul.bf16.gmra.mxu2 %v1098_v46  ;;  %v1099_v46 = vld [vmem:[#allocation8 + $0x10] sm:$0xff] }
  0x4f   :  { %1174 = vmatpush.bf16.msrb.mxu3 %v1090_v33 }
  0x53   :  { %1175 = vmatpush.bf16.msrb.mxu3 %v1089_v36 }
  0x56   :  { %255 = vmatmul.bf16.gmra.mxu0 %v1075_v12 }
  0x57   :  { %1176 = vmatpush.bf16.msra.mxu3 %v1112_v14 }
  0x5b   :  { %1177 = vmatpush.bf16.msra.mxu3 %v1111_v17 }
  0x5c   :  { %813 = vmatmul.bf16.gmra.mxu2 %v1099_v46 }
  0x5f   :  { %1178 = vmatpush.bf16.msra.mxu3 %v1488_v18 }
  0x63   :  { %1179 = vmatpush.bf16.msra.mxu3 %v1491_v20 }
  0x66   :  { %260 = vmatmul.bf16.gmra.mxu0 %v1076_v13 }
  0x67   :  { %1180 = vmatpush.bf16.msra.mxu3 %v1494_v22 }
  0x6b   :  { %1181 = vmatpush.bf16.msra.mxu3 %v1497_v24 }
  0x6f   :  { %1182 = vmatpush.bf16.msra.mxu3 %v1500_v26 }
  0x73   :  { %1183 = vmatpush.bf16.msra.mxu3 %v1503_v28 }
  0x76   :  { %265 = vmatmul.bf16.gmra.mxu0 %v1077_v15 }
  0x86   :  { %270 = vmatmul.bf16.gmra.mxu0 %v1078_v16 }
  0xb3   :  { %v246_v32 = vpop.f32.mrf.mxu0 }
  0xb4   :  { %v1512_v34 = vadd.f32 %v1509_v31, %v246_v32 }
  0xb6   :  { %v1515_v35 = vmul.f32 0.5, %v1512_v34 }
  0xb8   :  { %v302_v37 = vmin.f32 %v1515_v35, 14.0  ;;  %vm318_vm1 = vcmp.le.f32.partialorder %v1515_v35, 14.0 }
  0xb9   :  { %v276_v38 = vpop.f32.mrf.mxu3 }
  0xba   :  { %v334_v39 = vmul.f32 1.442695, %v302_v37  ;;  %v1519_v40 = vadd.f32 %v1509_v31, %v276_v38 }
  0xbb   :  { %v248_v41 = vpop.f32.mrf.mxu0 }
  0xbc   :  { %1194 = vpow2.f32 %v334_v39  ;;  %v1522_v42 = vmul.f32 0.5, %v1519_v40  ;;  %v1525_v43 = vadd.f32 %v1509_v31, %v248_v41 }
  0xbe   :  { %v314_v44 = vmin.f32 %v1522_v42, 14.0  ;;  %v1529_v45 = vmul.f32 0.5, %v1525_v43  ;;  %vm330_vm4 = vcmp.le.f32.partialorder %v1522_v42, 14.0 }
  0xc0   :  { %v358_v47 = vmul.f32 1.442695, %v314_v44  ;;  %v303_v48 = vmin.f32 %v1529_v45, 14.0  ;;  %vm319_vm5 = vcmp.le.f32.partialorder %v1529_v45, 14.0 }
  0xc1   :  { %v278_v49 = vpop.f32.mrf.mxu3 }
  0xc2   :  { %v1195_v50 = vpop.eup %1194  ;;  %1196 = vpow2.f32 %v358_v47  ;;  %v336_v51 = vmul.f32 1.442695, %v303_v48  ;;  %v1533_v52 = vadd.f32 %v1509_v31, %v278_v49 }
  0xc3   :  { %v251_v53 = vpop.f32.mrf.mxu0  ;;  %v366_v54 = vadd.f32 1.0, %v1195_v50  ;;  %v369_v55 = vmul.f32 -0.5, %v1195_v50  ;;  %v372_v1 = vand.u32 2147483647, %v1195_v50 }
  0xc4   :  { %1198 = vpow2.f32 %v336_v51  ;;  %v1537_v56 = vmul.f32 0.5, %v1533_v52  ;;  %v1540_v57 = vadd.f32 %v1509_v31, %v251_v53 }
  0xc5   :  { %1200 = vlog2.f32 %v366_v54  ;;  %v370_v60 = vadd.f32 1.0, %v369_v55  ;;  %vm1558_vm0 = vcmp.lt.f32.partialorder %v372_v1, 0.0004427343 }
  0xc6   :  { %v315_v58 = vmin.f32 %v1537_v56, 14.0  ;;  %v1544_v59 = vmul.f32 0.5, %v1540_v57  ;;  %vm331_vm6 = vcmp.le.f32.partialorder %v1537_v56, 14.0 }
  0xc7   :  { %v371_v9 = vmul.f32 %v1195_v50, %v370_v60 }
  0xc8   :  { %v1197_v61 = vpop.eup %1196  ;;  %v360_v62 = vmul.f32 1.442695, %v315_v58  ;;  %v304_v63 = vmin.f32 %v1544_v59, 14.0  ;;  %vm320_vm11 = vcmp.le.f32.partialorder %v1544_v59, 14.0 }
  0xc9   :  { %v281_v0 = vpop.f32.mrf.mxu3  ;;  %v474_v2 = vadd.f32 1.0, %v1197_v61  ;;  %v477_v3 = vmul.f32 -0.5, %v1197_v61  ;;  %v480_v21 = vand.u32 2147483647, %v1197_v61 }
  0xca   :  { %v1199_v4 = vpop.eup %1198  ;;  %1202 = vpow2.f32 %v360_v62  ;;  %v338_v5 = vmul.f32 1.442695, %v304_v63  ;;  %v1549_v6 = vadd.f32 %v1509_v31, %v281_v0 }
  0xcb   :  { %v1201_v7 = vpop.eup %1200  ;;  %v253_v8 = vpop.f32.mrf.mxu0  ;;  %v375_v10 = vadd.f32 1.0, %v1199_v4  ;;  %v378_v11 = vmul.f32 -0.5, %v1199_v4  ;;  %1204 = vlog2.f32 %v474_v2  ;;  %v478_v17 = vadd.f32 1.0, %v477_v3 }
  0xcc   :  { %1206 = vpow2.f32 %v338_v5  ;;  %v1553_v12 = vmul.f32 0.5, %v1549_v6  ;;  %v1556_v13 = vadd.f32 %v1509_v31, %v253_v8  ;;  %v368_v14 = vmul.f32 0.6931472, %v1201_v7 }
  0xcd   :  { %1208 = vlog2.f32 %v375_v10  ;;  %v379_v16 = vadd.f32 1.0, %v378_v11  ;;  %v381_v29 = vand.u32 2147483647, %v1199_v4  ;;  %v479_v36 = vmul.f32 %v1197_v61, %v478_v17 }
  0xce   :  { %v316_v18 = vmin.f32 %v1553_v12, 14.0  ;;  %v1564_v19 = vmul.f32 0.5, %v1556_v13  ;;  %v374_v20 = vsel %vm1558_vm0, %v371_v9, %v368_v14  ;;  %vm1576_vm2 = vcmp.lt.f32.partialorder %v480_v21, 0.0004427343 }
  0xcf   :  { %v380_v27 = vmul.f32 %v1199_v4, %v379_v16  ;;  %v510_v33 = vmul.f32 2.0, %v374_v20  ;;  %vm382_vm3 = vcmp.lt.f32.partialorder %v381_v29, 0.0004427343  ;;  %vm332_vm14 = vcmp.le.f32.partialorder %v1553_v12, 14.0 }
  0xd0   :  { %v1203_v22 = vpop.eup %1202  ;;  %v362_v23 = vmul.f32 1.442695, %v316_v18  ;;  %v305_v25 = vmin.f32 %v1564_v19, 14.0  ;;  %vm321_vm12 = vcmp.le.f32.partialorder %v1564_v19, 14.0 }
  0xd1   :  { %v1205_v30 = vpop.eup %1204  ;;  %v283_v32 = vpop.f32.mrf.mxu3  ;;  %v483_v37 = vadd.f32 1.0, %v1203_v22  ;;  %v486_v38 = vmul.f32 -0.5, %v1203_v22  ;;  %v489_v58 = vand.u32 2147483647, %v1203_v22  ;;  %v526_v4 = vsel %vm318_vm1, %v510_v33, %v1512_v34 }
  0xd2   :  { %v1571_v39 = vpop.eup %1206  ;;  %1210 = vpow2.f32 %v362_v23  ;;  %v340_v41 = vmul.f32 1.442695, %v305_v25  ;;  %v1574_v44 = vadd.f32 %v1509_v31, %v283_v32  ;;  %v476_v24 = vmul.f32 0.6931472, %v1205_v30 }
  0xd3   :  { %v1209_v47 = vpop.eup %1208  ;;  %v256_v48 = vpop.f32.mrf.mxu0  ;;  %1212 = vlog2.f32 %v483_v37  ;;  %v487_v50 = vadd.f32 1.0, %v486_v38  ;;  %v384_v51 = vadd.f32 1.0, %v1571_v39  ;;  %v387_v60 = vmul.f32 -0.5, %v1571_v39 }
  0xd4   :  { %1214 = vpow2.f32 %v340_v41  ;;  %v1583_v53 = vmul.f32 0.5, %v1574_v44  ;;  %v1586_v54 = vadd.f32 %v1509_v31, %v256_v48  ;;  %v377_v55 = vmul.f32 0.6931472, %v1209_v47 }
  0xd5   :  { %1216 = vlog2.f32 %v384_v51  ;;  %v482_v63 = vsel %vm1576_vm2, %v479_v36, %v476_v24  ;;  %v488_v5 = vmul.f32 %v1203_v22, %v487_v50  ;;  %vm1606_vm7 = vcmp.lt.f32.partialorder %v489_v58, 0.0004427343  ;;  %v1100_v50 = vld [vmem:[#allocation8 + $0x18] sm:$0xff] }
  0xd6   :  { %v317_v61 = vmin.f32 %v1583_v53, 14.0  ;;  %v1591_v62 = vmul.f32 0.5, %v1586_v54  ;;  %v383_v26 = vsel %vm382_vm3, %v380_v27, %v377_v55  ;;  %v522_v9 = vmul.f32 2.0, %v482_v63  ;;  %818 = vmatmul.bf16.gmra.mxu2 %v1100_v50 }
  0xd7   :  { %v511_v0 = vmul.f32 2.0, %v383_v26  ;;  %v388_v10 = vadd.f32 1.0, %v387_v60  ;;  %v390_v35 = vand.u32 2147483647, %v1571_v39  ;;  %vm333_vm15 = vcmp.le.f32.partialorder %v1583_v53, 14.0 }
  0xd8   :  { %v1599_v1 = vpop.eup %1210  ;;  %v364_v2 = vmul.f32 1.442695, %v317_v61  ;;  %v306_v3 = vmin.f32 %v1591_v62, 14.0  ;;  %v538_v33 = vsel %vm330_vm4, %v522_v9, %v1519_v40  ;;  %vm322_vm2 = vcmp.le.f32.partialorder %v1591_v62, 14.0 }
  0xd9   :  { %v1213_v7 = vpop.eup %1212  ;;  %v527_v8 = vsel %vm319_vm5, %v511_v0, %v1525_v43  ;;  %v492_v20 = vadd.f32 1.0, %v1599_v1  ;;  %v389_v25 = vmul.f32 %v1571_v39, %v388_v10  ;;  %v495_v32 = vmul.f32 -0.5, %v1599_v1 }
  0xda   :  { %v1215_v28 = vpop.eup %1214  ;;  %1218 = vpow2.f32 %v364_v2  ;;  %v342_v11 = vmul.f32 1.442695, %v306_v3  ;;  %v542_v14 = vpack.c.bf16 %v527_v8, %v526_v4  ;;  %v485_v15 = vmul.f32 0.6931472, %v1213_v7 }
  0xdb   :  { %v1217_v16 = vpop.eup %1216  ;;  %v258_v17 = vpop.f32.mrf.mxu0  ;;  %v393_v34 = vadd.f32 1.0, %v1215_v28  ;;  %v396_v18 = vmul.f32 -0.5, %v1215_v28  ;;  %v399_v27 = vand.u32 2147483647, %v1215_v28  ;;  %vm1628_vm8 = vcmp.lt.f32.partialorder %v390_v35, 0.0004427343 }
  0xdc   :  { %1220 = vpow2.f32 %v342_v11  ;;  %v1613_v43 = vadd.f32 %v1509_v31, %v258_v17  ;;  %626 = vmatmul.bf16.vlgmr.msra.gmra.mxu1 %v542_v14  ;;  %v491_v21 = vsel %vm1606_vm7, %v488_v5, %v485_v15  ;;  %v386_v22 = vmul.f32 0.6931472, %v1217_v16 }
  0xdd   :  { %v523_v23 = vmul.f32 2.0, %v491_v21  ;;  %1222 = vlog2.f32 %v393_v34  ;;  %v397_v30 = vadd.f32 1.0, %v396_v18  ;;  %v496_v46 = vadd.f32 1.0, %v495_v32 }
  0xde   :  { %v1619_v29 = vmul.f32 0.5, %v1613_v43  ;;  %1224 = vlog2.f32 %v492_v20  ;;  %v392_v24 = vsel %vm1628_vm8, %v389_v25, %v386_v22  ;;  %v498_v47 = vand.u32 2147483647, %v1599_v1 }
  0xdf   :  { %v539_v36 = vsel %vm331_vm6, %v523_v23, %v1533_v52  ;;  %v398_v52 = vmul.f32 %v1215_v28, %v397_v30  ;;  %vm1636_vm9 = vcmp.lt.f32.partialorder %v399_v27, 0.0004427343  ;;  %v512_v58 = vmul.f32 2.0, %v392_v24 }
  0xe0   :  { %v1219_v38 = vpop.eup %1218  ;;  %v307_v39 = vmin.f32 %v1619_v29, 14.0  ;;  %v548_v41 = vpack.c.bf16 %v539_v36, %v538_v33  ;;  %v497_v60 = vmul.f32 %v1599_v1, %v496_v46  ;;  %vm1644_vm10 = vcmp.lt.f32.partialorder %v498_v47, 0.0004427343  ;;  %v1101_v47 = vld [vmem:[#allocation8 + $0x20] sm:$0xff] }
  0xe1   :  { %v501_v42 = vadd.f32 1.0, %v1219_v38  ;;  %v504_v40 = vmul.f32 -0.5, %v1219_v38  ;;  %v507_v5 = vand.u32 2147483647, %v1219_v38  ;;  %v528_v14 = vsel %vm320_vm11, %v512_v58, %v1540_v57 }
  0xe2   :  { %v1221_v48 = vpop.eup %1220  ;;  %v344_v49 = vmul.f32 1.442695, %v307_v39  ;;  %656 = vmatmul.bf16.vlgmr.msrb.gmra.mxu3 %v548_v41  ;;  %vm323_vm3 = vcmp.le.f32.partialorder %v1619_v29, 14.0 }
  0xe3   :  { %v1223_v51 = vpop.eup %1222  ;;  %v261_v55 = vpop.f32.mrf.mxu0  ;;  %1226 = vlog2.f32 %v501_v42  ;;  %v402_v61 = vadd.f32 1.0, %v1221_v48  ;;  %v505_v2 = vadd.f32 1.0, %v504_v40  ;;  %v405_v45 = vmul.f32 -0.5, %v1221_v48 }
  0xe4   :  { %v1225_v26 = vpop.eup %1224  ;;  %1228 = vpow2.f32 %v344_v49  ;;  %v1642_v63 = vadd.f32 %v1509_v31, %v261_v55  ;;  %v395_v0 = vmul.f32 0.6931472, %v1223_v51  ;;  %vm508_vm13 = vcmp.lt.f32.partialorder %v507_v5, 0.0004427343 }
  0xe5   :  { %v494_v3 = vmul.f32 0.6931472, %v1225_v26  ;;  %1230 = vlog2.f32 %v402_v61  ;;  %v506_v28 = vmul.f32 %v1219_v38, %v505_v2  ;;  %v406_v19 = vadd.f32 1.0, %v405_v45 }
  0xe6   :  { %v1649_v7 = vmul.f32 0.5, %v1642_v63  ;;  %v401_v1 = vsel %vm1636_vm9, %v398_v52, %v395_v0  ;;  %v408_v27 = vand.u32 2147483647, %v1221_v48  ;;  %823 = vmatmul.bf16.gmra.mxu2 %v1101_v47  ;;  %v1104_v47 = vld [vmem:[#allocation8 + $0x38] sm:$0xff] }
  0xe7   :  { %v513_v8 = vmul.f32 2.0, %v401_v1  ;;  %v500_v10 = vsel %vm1644_vm10, %v497_v60, %v494_v3  ;;  %v407_v38 = vmul.f32 %v1221_v48, %v406_v19 }
  0xe8   :  { %v308_v9 = vmin.f32 %v1649_v7, 14.0  ;;  %v524_v20 = vmul.f32 2.0, %v500_v10  ;;  %vm1671_vm0 = vcmp.lt.f32.partialorder %v408_v27, 0.0004427343  ;;  %vm324_vm6 = vcmp.le.f32.partialorder %v1649_v7, 14.0 }
  0xe9   :  { %v1227_v11 = vpop.eup %1226  ;;  %v529_v15 = vsel %vm321_vm12, %v513_v8, %v1556_v13 }
  0xea   :  { %v1229_v16 = vpop.eup %1228  ;;  %v346_v17 = vmul.f32 1.442695, %v308_v9  ;;  %v543_v35 = vpack.c.bf16 %v529_v15, %v528_v14  ;;  %v503_v59 = vmul.f32 0.6931472, %v1227_v11  ;;  %v540_v32 = vsel %vm332_vm14, %v524_v20, %v1549_v6  ;;  %v1102_v11 = vld [vmem:[#allocation8 + $0x28] sm:$0xff] }
  0xeb   :  { %v1231_v34 = vpop.eup %1230  ;;  %v263_v18 = vpop.f32.mrf.mxu0  ;;  %v411_v21 = vadd.f32 1.0, %v1229_v16  ;;  %v414_v25 = vmul.f32 -0.5, %v1229_v16  ;;  %v417_v12 = vand.u32 2147483647, %v1229_v16 }
  0xec   :  { %1232 = vpow2.f32 %v346_v17  ;;  %v1661_v22 = vadd.f32 %v1509_v31, %v263_v18  ;;  %631 = vmatmul.bf16.gmra.mxu1 %v543_v35  ;;  %v509_v23 = vsel %vm508_vm13, %v506_v28, %v503_v59  ;;  %v404_v30 = vmul.f32 0.6931472, %v1231_v34 }
  0xed   :  { %v525_v57 = vmul.f32 2.0, %v509_v23  ;;  %1234 = vlog2.f32 %v411_v21  ;;  %v415_v39 = vadd.f32 1.0, %v414_v25  ;;  %vm418_vm1 = vcmp.lt.f32.partialorder %v417_v12, 0.0004427343 }
  0xee   :  { %v1666_v13 = vmul.f32 0.5, %v1661_v22  ;;  %v410_v46 = vsel %vm1671_vm0, %v407_v38, %v404_v30 }
  0xef   :  { %v541_v33 = vsel %vm333_vm15, %v525_v57, %v1574_v44  ;;  %v416_v49 = vmul.f32 %v1229_v16, %v415_v39  ;;  %v514_v52 = vmul.f32 2.0, %v410_v46 }
  0xf0   :  { %v309_v36 = vmin.f32 %v1666_v13, 14.0  ;;  %v549_v37 = vpack.c.bf16 %v541_v33, %v540_v32  ;;  %vm325_vm7 = vcmp.le.f32.partialorder %v1666_v13, 14.0 }
  0xf1   :  { %v530_v60 = vsel %vm322_vm2, %v514_v52, %v1586_v54  ;;  %v1103_v54 = vld [vmem:[#allocation8 + $0x30] sm:$0xff] }
  0xf2   :  { %v1233_v24 = vpop.eup %1232  ;;  %v348_v53 = vmul.f32 1.442695, %v309_v36  ;;  %661 = vmatmul.bf16.gmra.mxu3 %v549_v37 }
  0xf3   :  { %v1235_v6 = vpop.eup %1234  ;;  %v266_v42 = vpop.f32.mrf.mxu0  ;;  %v420_v44 = vadd.f32 1.0, %v1233_v24  ;;  %v423_v58 = vmul.f32 -0.5, %v1233_v24  ;;  %v426_v8 = vand.u32 2147483647, %v1233_v24 }
  0xf4   :  { %1236 = vpow2.f32 %v348_v53  ;;  %v1678_v40 = vadd.f32 %v1509_v31, %v266_v42  ;;  %v413_v48 = vmul.f32 0.6931472, %v1235_v6 }
  0xf5   :  { %1238 = vlog2.f32 %v420_v44  ;;  %v424_v62 = vadd.f32 1.0, %v423_v58  ;;  %vm427_vm4 = vcmp.lt.f32.partialorder %v426_v8, 0.0004427343 }
  0xf6   :  { %v1681_v56 = vmul.f32 0.5, %v1678_v40  ;;  %v419_v50 = vsel %vm418_vm1, %v416_v49, %v413_v48  ;;  %828 = vmatmul.bf16.gmra.mxu2 %v1102_v11 }
  0xf7   :  { %v515_v51 = vmul.f32 2.0, %v419_v50  ;;  %v425_v10 = vmul.f32 %v1233_v24, %v424_v62 }
  0xf8   :  { %v310_v55 = vmin.f32 %v1681_v56, 14.0  ;;  %vm326_vm10 = vcmp.le.f32.partialorder %v1681_v56, 14.0 }
  0xf9   :  { %v531_v61 = vsel %vm323_vm3, %v515_v51, %v1613_v43 }
  0xfa   :  { %v1237_v26 = vpop.eup %1236  ;;  %v350_v0 = vmul.f32 1.442695, %v310_v55  ;;  %v544_v2 = vpack.c.bf16 %v531_v61, %v530_v60 }
  0xfb   :  { %v1239_v3 = vpop.eup %1238  ;;  %v268_v4 = vpop.f32.mrf.mxu0  ;;  %v429_v5 = vadd.f32 1.0, %v1237_v26  ;;  %v432_v29 = vmul.f32 -0.5, %v1237_v26  ;;  %v435_v14 = vand.u32 2147483647, %v1237_v26 }
  0xfc   :  { %1240 = vpow2.f32 %v350_v0  ;;  %v1689_v1 = vadd.f32 %v1509_v31, %v268_v4  ;;  %636 = vmatmul.bf16.gmra.mxu1 %v544_v2  ;;  %v422_v43 = vmul.f32 0.6931472, %v1239_v3 }
  0xfd   :  { %1242 = vlog2.f32 %v429_v5  ;;  %v433_v28 = vadd.f32 1.0, %v432_v29  ;;  %vm436_vm5 = vcmp.lt.f32.partialorder %v435_v14, 0.0004427343 }
  0xfe   :  { %v1692_v45 = vmul.f32 0.5, %v1689_v1  ;;  %v428_v17 = vsel %vm427_vm4, %v425_v10, %v422_v43 }
  0xff   :  { %v434_v19 = vmul.f32 %v1237_v26, %v433_v28  ;;  %v516_v21 = vmul.f32 2.0, %v428_v17 }
 0x100   :  { %v311_v9 = vmin.f32 %v1692_v45, 14.0  ;;  %vm327_vm11 = vcmp.le.f32.partialorder %v1692_v45, 14.0 }
 0x101   :  { %v532_v32 = vsel %vm324_vm6, %v516_v21, %v1642_v63  ;;  %v1716_v21 = vld [vmem:[%s1744_s4] ss:$0 sm:$0xff]  ;;  %s1417_s4 = smov [#allocation11]  }
 0x102   :  { %v1241_v15 = vpop.eup %1240  ;;  %v352_v16 = vmul.f32 1.442695, %v311_v9  ;;  %833 = vmatmul.bf16.vlgmr.msra.gmra.mxu3 %v1103_v54  ;;  %s896_s26 = sshll.u32 %s1417_s4, 4  ;;  %s897_s26 = int_to_ptr.vmem [resolvable:$true] %s896_s26 }
 0x103   :  { %v1243_v35 = vpop.eup %1242  ;;  %v271_v59 = vpop.f32.mrf.mxu0  ;;  %v438_v34 = vadd.f32 1.0, %v1241_v15  ;;  %v441_v30 = vmul.f32 -0.5, %v1241_v15  ;;  %v444_v13 = vand.u32 2147483647, %v1241_v15 }
 0x104   :  { %1244 = vpow2.f32 %v352_v16  ;;  %v1696_v18 = vadd.f32 %v1509_v31, %v271_v59  ;;  %v431_v20 = vmul.f32 0.6931472, %v1243_v35  ;;  %v804_v59 = vpop.f32.mrf.mxu2 }
 0x105   :  { %1246 = vlog2.f32 %v438_v34  ;;  %v442_v7 = vadd.f32 1.0, %v441_v30  ;;  %vm445_vm8 = vcmp.lt.f32.partialorder %v444_v13, 0.0004427343 }
 0x106   :  { %v1699_v23 = vmul.f32 0.5, %v1696_v18  ;;  %v437_v25 = vsel %vm436_vm5, %v434_v19, %v431_v20 }
 0x107   :  { %v517_v57 = vmul.f32 2.0, %v437_v25  ;;  %v443_v42 = vmul.f32 %v1241_v15, %v442_v7 }
 0x108   :  { %v312_v27 = vmin.f32 %v1699_v23, 14.0  ;;  %vm328_vm14 = vcmp.le.f32.partialorder %v1699_v23, 14.0 }
 0x109   :  { %v533_v33 = vsel %vm325_vm7, %v517_v57, %v1661_v22 }
 0x10a   :  { %v1245_v36 = vpop.eup %1244  ;;  %v354_v37 = vmul.f32 1.442695, %v312_v27  ;;  %v545_v38 = vpack.c.bf16 %v533_v33, %v532_v32 }
 0x10b   :  { %v1247_v39 = vpop.eup %1246  ;;  %v273_v41 = vpop.f32.mrf.mxu0  ;;  %v447_v12 = vadd.f32 1.0, %v1245_v36  ;;  %v450_v53 = vmul.f32 -0.5, %v1245_v36  ;;  %v453_v44 = vand.u32 2147483647, %v1245_v36 }
 0x10c   :  { %1248 = vpow2.f32 %v354_v37  ;;  %v274_v24 = vadd.f32 %v1509_v31, %v273_v41  ;;  %641 = vmatmul.bf16.gmra.mxu1 %v545_v38  ;;  %v440_v6 = vmul.f32 0.6931472, %v1247_v39  ;;  %v806_v34 = vpop.f32.mrf.mxu2 }
 0x10d   :  { %1250 = vlog2.f32 %v447_v12  ;;  %v451_v22 = vadd.f32 1.0, %v450_v53  ;;  %vm454_vm9 = vcmp.lt.f32.partialorder %v453_v44, 0.0004427343 }
 0x10e   :  { %v297_v46 = vmul.f32 0.5, %v274_v24  ;;  %v446_v52 = vsel %vm445_vm8, %v443_v42, %v440_v6 }
 0x10f   :  { %v452_v55 = vmul.f32 %v1245_v36, %v451_v22  ;;  %v518_v58 = vmul.f32 2.0, %v446_v52 }
 0x110   :  { %v313_v63 = vmin.f32 %v297_v46, 14.0  ;;  %vm329_vm15 = vcmp.le.f32.partialorder %v297_v46, 14.0 }
 0x111   :  { %v534_v0 = vsel %vm326_vm10, %v518_v58, %v1678_v40 }
 0x112   :  { %v1249_v48 = vpop.eup %1248  ;;  %v356_v49 = vmul.f32 1.442695, %v313_v63  ;;  %838 = vmatmul.bf16.gmra.mxu3 %v1104_v47 }
 0x113   :  { %v1251_v50 = vpop.eup %1250  ;;  %v456_v51 = vadd.f32 1.0, %v1249_v48  ;;  %v459_v26 = vmul.f32 -0.5, %v1249_v48  ;;  %v462_v54 = vand.u32 2147483647, %v1249_v48 }
 0x114   :  { %1252 = vpow2.f32 %v356_v49  ;;  %v449_v31 = vmul.f32 0.6931472, %v1251_v50  ;;  %v809_v19 = vpop.f32.mrf.mxu2 }
 0x115   :  { %1254 = vlog2.f32 %v456_v51  ;;  %v460_v29 = vadd.f32 1.0, %v459_v26  ;;  %vm463_vm12 = vcmp.lt.f32.partialorder %v462_v54, 0.0004427343 }
 0x116   :  { %v455_v60 = vsel %vm454_vm9, %v452_v55, %v449_v31 }
 0x117   :  { %v519_v61 = vmul.f32 2.0, %v455_v60  ;;  %v461_v9 = vmul.f32 %v1249_v48, %v460_v29 }
 0x119   :  { %v535_v2 = vsel %vm327_vm11, %v519_v61, %v1689_v1 }
 0x11a   :  { %v1253_v3 = vpop.eup %1252  ;;  %v546_v4 = vpack.c.bf16 %v535_v2, %v534_v0 }
 0x11b   :  { %v1255_v5 = vpop.eup %1254  ;;  %v465_v62 = vadd.f32 1.0, %v1253_v3  ;;  %v468_v8 = vmul.f32 -0.5, %v1253_v3  ;;  %v471_v56 = vand.u32 2147483647, %v1253_v3 }
 0x11c   :  { %646 = vmatmul.bf16.gmra.mxu1 %v546_v4  ;;  %v458_v43 = vmul.f32 0.6931472, %v1255_v5  ;;  %v811_v27 = vpop.f32.mrf.mxu2 }
 0x11d   :  { %1256 = vlog2.f32 %v465_v62  ;;  %v469_v10 = vadd.f32 1.0, %v468_v8  ;;  %vm472_vm13 = vcmp.lt.f32.partialorder %v471_v56, 0.0004427343 }
 0x11e   :  { %v464_v45 = vsel %vm463_vm12, %v461_v9, %v458_v43 }
 0x11f   :  { %v470_v40 = vmul.f32 %v1253_v3, %v469_v10  ;;  %v520_v1 = vmul.f32 2.0, %v464_v45 }
 0x121   :  { %v536_v16 = vsel %vm328_vm14, %v520_v1, %v1696_v18 }
 0x123   :  { %v1257_v28 = vpop.eup %1256 }
 0x124   :  { %v467_v11 = vmul.f32 0.6931472, %v1257_v28  ;;  %v814_v38 = vpop.f32.mrf.mxu2 }
 0x126   :  { %v473_v14 = vsel %vm472_vm13, %v470_v40, %v467_v11 }
 0x127   :  { %v521_v15 = vmul.f32 2.0, %v473_v14 }
 0x129   :  { %v537_v17 = vsel %vm329_vm15, %v521_v15, %v274_v24 }
 0x12a   :  { %v547_v35 = vpack.c.bf16 %v537_v17, %v536_v16 }
 0x12c   :  { %651 = vmatmul.bf16.gmra.mxu1 %v547_v35  ;;  %v816_v46 = vpop.f32.mrf.mxu2 }
 0x159   :  { %v627_v20 = vpop.f32.mrf.mxu1  ;;  %v819_v22 = vpop.f32.mrf.mxu2 }
 0x15a   :  { %v628_v25 = vadd.f32 %v1716_v21, %v627_v20 }
 0x15c   :  { %v844_v30 = vmul.f32 %v804_v59, %v628_v25 }
 0x161   :  { %v629_v57 = vpop.f32.mrf.mxu1  ;;  %v821_v31 = vpop.f32.mrf.mxu2 }
 0x162   :  { %v630_v23 = vadd.f32 %v1716_v21, %v629_v57 }
 0x164   :  { %v845_v18 = vmul.f32 %v806_v34, %v630_v23 }
 0x165   :  { %v657_v32 = vpop.f32.mrf.mxu3 }
 0x166   :  { %v1116_v33 = vpack.c.bf16 %v845_v18, %v844_v30  ;;  %v658_v55 = vadd.f32 %v1716_v21, %v657_v32 }
 0x168   :  { %1117 = vst [vmem:[#allocation11] sm:$0xff] %v1116_v33  }
 0x169   :  { %v632_v36 = vpop.f32.mrf.mxu1  ;;  %v824_v29 = vpop.f32.mrf.mxu2 }
 0x16a   :  { %v633_v39 = vadd.f32 %v1716_v21, %v632_v36 }
 0x16c   :  { %v846_v24 = vmul.f32 %v809_v19, %v633_v39 }
 0x16d   :  { %v659_v37 = vpop.f32.mrf.mxu3 }
 0x16e   :  { %v660_v58 = vadd.f32 %v1716_v21, %v659_v37 }
 0x171   :  { %v634_v41 = vpop.f32.mrf.mxu1  ;;  %v826_v11 = vpop.f32.mrf.mxu2 }
 0x172   :  { %v635_v12 = vadd.f32 %v1716_v21, %v634_v41 }
 0x174   :  { %v847_v7 = vmul.f32 %v811_v27, %v635_v12 }
 0x175   :  { %v662_v53 = vpop.f32.mrf.mxu3 }
 0x176   :  { %v1121_v13 = vpack.c.bf16 %v847_v7, %v846_v24  ;;  %v663_v9 = vadd.f32 %v1716_v21, %v662_v53 }
 0x178   :  { %1153 = vst [vmem:[#allocation11 + $0x8] sm:$0xff] %v1121_v13  }
 0x179   :  { %v637_v47 = vpop.f32.mrf.mxu1  ;;  %v829_v59 = vpop.f32.mrf.mxu2 }
 0x17a   :  { %v638_v63 = vadd.f32 %v1716_v21, %v637_v47 }
 0x17c   :  { %v848_v48 = vmul.f32 %v814_v38, %v638_v63 }
 0x17d   :  { %v664_v6 = vpop.f32.mrf.mxu3 }
 0x17e   :  { %v665_v10 = vadd.f32 %v1716_v21, %v664_v6 }
 0x181   :  { %v639_v42 = vpop.f32.mrf.mxu1  ;;  %v831_v57 = vpop.f32.mrf.mxu2 }
 0x182   :  { %v640_v44 = vadd.f32 %v1716_v21, %v639_v42 }
 0x184   :  { %v849_v49 = vmul.f32 %v816_v46, %v640_v44 }
 0x185   :  { %v834_v52 = vpop.f32.mrf.mxu3 }
 0x186   :  { %v1126_v50 = vpack.c.bf16 %v849_v49, %v848_v48  ;;  %v856_v61 = vmul.f32 %v834_v52, %v658_v55 }
 0x188   :  { %1154 = vst [vmem:[#allocation11 + $0x10] sm:$0xff] %v1126_v50  }
 0x189   :  { %v642_v51 = vpop.f32.mrf.mxu1 }
 0x18a   :  { %v643_v0 = vadd.f32 %v1716_v21, %v642_v51 }
 0x18c   :  { %v850_v5 = vmul.f32 %v819_v22, %v643_v0 }
 0x18d   :  { %v836_v60 = vpop.f32.mrf.mxu3 }
 0x18e   :  { %v857_v26 = vmul.f32 %v836_v60, %v660_v58 }
 0x190   :  { %v1146_v2 = vpack.c.bf16 %v857_v26, %v856_v61 }
 0x191   :  { %v644_v3 = vpop.f32.mrf.mxu1 }
 0x192   :  { %1158 = vst [vmem:[#allocation11 + $0x30] sm:$0xff] %v1146_v2   ;;  %v645_v4 = vadd.f32 %v1716_v21, %v644_v3 }
 0x194   :  { %v851_v62 = vmul.f32 %v821_v31, %v645_v4 }
 0x195   :  { %v839_v8 = vpop.f32.mrf.mxu3 }
 0x196   :  { %v1131_v54 = vpack.c.bf16 %v851_v62, %v850_v5  ;;  %v858_v45 = vmul.f32 %v839_v8, %v663_v9 }
 0x198   :  { %1155 = vst [vmem:[#allocation11 + $0x18] sm:$0xff] %v1131_v54  }
 0x199   :  { %v647_v43 = vpop.f32.mrf.mxu1 }
 0x19a   :  { %v648_v40 = vadd.f32 %v1716_v21, %v647_v43 }
 0x19c   :  { %v852_v16 = vmul.f32 %v824_v29, %v648_v40 }
 0x19d   :  { %v841_v56 = vpop.f32.mrf.mxu3 }
 0x19e   :  { %v859_v28 = vmul.f32 %v841_v56, %v665_v10 }
 0x1a0   :  { %v1151_v1 = vpack.c.bf16 %v859_v28, %v858_v45 }
 0x1a1   :  { %v649_v14 = vpop.f32.mrf.mxu1 }
 0x1a2   :  { %1159 = vst [vmem:[#allocation11 + $0x38] sm:$0xff] %v1151_v1   ;;  %v650_v15 = vadd.f32 %v1716_v21, %v649_v14 }
 0x1a4   :  { %v853_v17 = vmul.f32 %v826_v11, %v650_v15 }
 0x1a6   :  { %v1136_v35 = vpack.c.bf16 %v853_v17, %v852_v16 }
 0x1a8   :  { %1156 = vst [vmem:[#allocation11 + $0x20] sm:$0xff] %v1136_v35  }
 0x1a9   :  { %v652_v34 = vpop.f32.mrf.mxu1 }
 0x1aa   :  { %v653_v20 = vadd.f32 %v1716_v21, %v652_v34 }
 0x1ac   :  { %v854_v23 = vmul.f32 %v829_v59, %v653_v20 }
 0x1b1   :  { %v654_v19 = vpop.f32.mrf.mxu1 }
 0x1b2   :  { %v655_v25 = vadd.f32 %v1716_v21, %v654_v19 }
 0x1b4   :  { %v855_v27 = vmul.f32 %v831_v57, %v655_v25 }
 0x1b6   :  { %v1141_v30 = vpack.c.bf16 %v855_v27, %v854_v23 }
 0x1b8   :  { %1157 = vst [vmem:[#allocation11 + $0x28] sm:$0xff] %v1141_v30  }
 0x1b9   :  { %904 = dma.vmem_to_hbm [thread:$0]  %s897_s26, 1024, %s899_s29, [#allocation4], %s1411_s9, %s1411_s9, %s1412_s10  }
 0x1ba   :  { %1408 = dma.done.wait [#allocation4], 1024  }
 0x1bb   :  { %1409 = vsyncadd [#allocation4], 4294966272 }
 0x1bc   :  { %909 = vsyncpa [#allocation3], 1 }
 0x1bd   :  { %910 = vsyncpa [#allocation6], 1 }
 0x1be   :  { %911 = vsyncpa [#allocation9], 1 }
 0x1bf   :  { %912 = vsyncpa [#allocation4], 1 }

</bundles_post_ra>
